<compile_context>
chip_gen: v7x
topology: tpu7x:2x2x1
jax: 0.10.0
libtpu: 0.0.40
codegen_flags: <defaults>
</compile_context>

<pallas_src>
import functools

import jax
import jax.numpy as jnp
from jax import lax
from jax.experimental import pallas as pl
from jax.experimental.pallas import tpu as pltpu

EPS = 1e-5  # nn.LayerNorm default eps


def _uniform_bits_u32(idx_u32, seed_u32):
    """Stateless lowbias32-style hash -> uniform uint32 per element (VPU-only)."""
    x = idx_u32 ^ (seed_u32 * jnp.uint32(0x9E3779B9))
    x = (x ^ lax.shift_right_logical(x, jnp.uint32(16))) * jnp.uint32(0x7FEB352D)
    x = (x ^ lax.shift_right_logical(x, jnp.uint32(15))) * jnp.uint32(0x846CA68B)
    x = x ^ lax.shift_right_logical(x, jnp.uint32(16))
    return x


def _sublayer_connection_kernel(seed_ref,              # scalar-prefetch (SMEM)
                                x_ref, g_ref, b_ref,   # input tile, LN gamma/beta
                                w_ref, wb_ref,         # sublayer Linear W (bf16), bias
                                o_ref,
                                *, dropout_p, train, tile_rows, hidden):
    x = x_ref[...].astype(jnp.float32)                            # (TN, H), f32

    # ---- LayerNorm over last dim (f32 on the VPU/EUP) -----------------------
    mean = jnp.mean(x, axis=-1, keepdims=True)
    var = jnp.mean(jnp.square(x - mean), axis=-1, keepdims=True)
    xn = (x - mean) * lax.rsqrt(var + EPS)
    xn = xn * g_ref[...].astype(jnp.float32) + b_ref[...].astype(jnp.float32)

    # ---- sublayer: Linear(H, H), bf16 operands on the MXU, f32 accumulate ---
    y = jnp.dot(xn.astype(jnp.bfloat16), w_ref[...],
                preferred_element_type=jnp.float32)
    y = y + wb_ref[...].astype(jnp.float32)

    # ---- dropout: integer-threshold compare on hashed global element index --
    if train and dropout_p > 0.0:
        row = (lax.broadcasted_iota(jnp.int32, y.shape, 0)
               + pl.program_id(0) * tile_rows)                    # global row id
        col = lax.broadcasted_iota(jnp.int32, y.shape, 1)
        idx = (row * hidden + col).astype(jnp.uint32)             # unique element id
        bits = _uniform_bits_u32(idx, seed_ref[0].astype(jnp.uint32))
        thresh = jnp.uint32(int(round(dropout_p * 4294967296.0)))
        keep = bits >= thresh                                     # P(keep) = 1 - p
        y = jnp.where(keep, y * jnp.float32(1.0 / (1.0 - dropout_p)),
                      jnp.float32(0.0))

    # ---- residual ------------------------------------------------------------
    o_ref[...] = (x + y).astype(o_ref.dtype)


def _pick_row_tile(n):
    """Largest convenient row tile that divides N (multiple of 8 for f32 sublanes)."""
    for tn in (1024, 512, 256, 128, 64, 32, 16, 8):
        if n % tn == 0:
            return tn
    return n  # fall back: whole array (legal since block dim == full dim)


def sublayer_connection(x, gamma, beta, w, wb, seed, *, dropout_p, train):
    """x: (B, S, H) float32.  Returns (B, S, H)."""
    assert 0.0 <= dropout_p < 1.0, "dropout_p must be in [0, 1)"
    B, S, H = x.shape
    N = B * S
    TN = _pick_row_tile(N)
    grid = (N // TN,)

    x2 = x.reshape(N, H)
    gamma2 = gamma.reshape(1, H)
    beta2 = beta.reshape(1, H)
    w_bf = w.astype(jnp.bfloat16)          # bf16-resident weight (MXU fast path)
    wb2 = wb.reshape(1, H)

    kernel = functools.partial(_sublayer_connection_kernel,
                               dropout_p=float(dropout_p), train=bool(train),
                               tile_rows=TN, hidden=H)

    cost = pl.CostEstimate(
        flops=2 * N * H * H,
        transcendentals=0,
        bytes_accessed=2 * N * H * 4 + H * H * 2 + 3 * H * 4,
    )

    out = pl.pallas_call(
        kernel,
        out_shape=jax.ShapeDtypeStruct((N, H), x.dtype),
        grid_spec=pltpu.PrefetchScalarGridSpec(
            num_scalar_prefetch=1,                              # seed -> SMEM
            grid=grid,
            in_specs=[
                pl.BlockSpec((TN, H), lambda i, s: (i, 0)),     # x tile (pipelined)
                pl.BlockSpec((1, H), lambda i, s: (0, 0)),      # gamma (resident)
                pl.BlockSpec((1, H), lambda i, s: (0, 0)),      # beta  (resident)
                pl.BlockSpec((H, H), lambda i, s: (0, 0)),      # W bf16 (resident)
                pl.BlockSpec((1, H), lambda i, s: (0, 0)),      # bias  (resident)
            ],
            out_specs=pl.BlockSpec((TN, H), lambda i, s: (i, 0)),
        ),
        compiler_params=pltpu.CompilerParams(
            dimension_semantics=("parallel",),                  # independent row tiles
            vmem_limit_bytes=48 * 1024 * 1024,
        ),
        cost_estimate=cost,
    )(seed, x2, gamma2, beta2, w_bf, wb2)
    return out.reshape(B, S, H)


def _reference_eval(x, gamma, beta, w_bf16, wb):
    # Pure-JAX reference with dropout disabled (eval mode); same bf16 matmul feed.
    mean = jnp.mean(x, axis=-1, keepdims=True)
    var = jnp.mean(jnp.square(x - mean), axis=-1, keepdims=True)
    xn = (x - mean) * lax.rsqrt(var + EPS) * gamma + beta
    y = jnp.einsum('bsh,hk->bsk', xn.astype(jnp.bfloat16), w_bf16,
                   preferred_element_type=jnp.float32) + wb
    return x + y


if __name__ == "__main__":
    B, S, H = 2, 8, 32
    dropout_p = 0.1

    key = jax.random.PRNGKey(0)
    kx, kw, kb = jax.random.split(key, 3)

    x = jax.random.normal(kx, (B, S, H), dtype=jnp.float32)

    # nn.LayerNorm(size) parameters (PyTorch default init: ones / zeros)
    gamma = jnp.ones((H,), dtype=jnp.float32)
    beta = jnp.zeros((H,), dtype=jnp.float32)

    # Deterministic example sublayer: Linear(H, H)
    # TODO(synk): the PyTorch module takes an arbitrary `sublayer` callable; a
    # fixed fused Linear(H, H) stands in for it here.
    w = jax.random.normal(kw, (H, H), dtype=jnp.float32) / jnp.sqrt(H)
    wb = jax.random.normal(kb, (H,), dtype=jnp.float32) * 0.01

    seed = jnp.array([1234], dtype=jnp.int32)

    # Eval-mode run (dropout == identity): check against pure-JAX reference.
    out_eval = sublayer_connection(x, gamma, beta, w, wb, seed,
                                   dropout_p=dropout_p, train=False)
    jax.block_until_ready(out_eval)
    ref = _reference_eval(x, gamma, beta, w.astype(jnp.bfloat16), wb)
    assert jnp.allclose(out_eval, ref, atol=2e-3, rtol=2e-3), "mismatch vs reference"

    # Train-mode run (stochastic dropout via in-kernel counter-based hash PRNG).
    out_train = sublayer_connection(x, gamma, beta, w, wb, seed,
                                    dropout_p=dropout_p, train=True)
    jax.block_until_ready(out_train)
    assert bool(jnp.all(jnp.isfinite(out_train))), "non-finite output in train mode"

    print("KERNEL_OK")
</pallas_src>

<mosaic_0001>
module attributes {stable_mosaic.version = 11 : i64} {
  func.func @_sublayer_connection_kernel(%arg0: i32, %arg1: memref<1xi32, #tpu.memory_space<smem>>, %arg2: memref<16x32xf32, #tpu.memory_space<vmem>>, %arg3: memref<1x32xf32, #tpu.memory_space<vmem>>, %arg4: memref<1x32xf32, #tpu.memory_space<vmem>>, %arg5: memref<32x32xbf16, #tpu.memory_space<vmem>>, %arg6: memref<1x32xf32, #tpu.memory_space<vmem>>, %arg7: memref<16x32xf32, #tpu.memory_space<vmem>>) attributes {dimension_semantics = [#tpu.dimension_semantics<parallel>], iteration_bounds = array<i64: 1>, scalar_prefetch = 1 : i64, scratch_operands = 0 : i64, tpu.core_type = #tpu.core_type<tc>, window_params = [{transform_indices = @transform_0, window_bounds = array<i64: 16, 32>}, {pipeline_mode = #tpu.pipeline_mode<synchronous>, transform_indices = @transform_1, window_bounds = array<i64: 1, 32>}, {pipeline_mode = #tpu.pipeline_mode<synchronous>, transform_indices = @transform_2, window_bounds = array<i64: 1, 32>}, {pipeline_mode = #tpu.pipeline_mode<synchronous>, transform_indices = @transform_3, window_bounds = array<i64: 32, 32>}, {pipeline_mode = #tpu.pipeline_mode<synchronous>, transform_indices = @transform_4, window_bounds = array<i64: 1, 32>}, {transform_indices = @transform_5, window_bounds = array<i64: 16, 32>}]} {
    %c0 = arith.constant 0 : index
    %c0_0 = arith.constant 0 : index
    %0 = vector.load %arg2[%c0, %c0_0] : memref<16x32xf32, #tpu.memory_space<vmem>>, vector<16x32xf32>
    %cst = arith.constant dense<0.000000e+00> : vector<16xf32>
    %1 = vector.multi_reduction <add>, %0, %cst [1] : vector<16x32xf32> to vector<16xf32>
    %2 = vector.shape_cast %1 : vector<16xf32> to vector<16x1xf32>
    %cst_1 = arith.constant 3.200000e+01 : f32
    %3 = vector.broadcast %cst_1 : f32 to vector<16x1xf32>
    %4 = arith.divf %2, %3 : vector<16x1xf32>
    %5 = vector.broadcast %4 : vector<16x1xf32> to vector<16x32xf32>
    %6 = arith.subf %0, %5 : vector<16x32xf32>
    %7 = arith.mulf %6, %6 : vector<16x32xf32>
    %cst_2 = arith.constant dense<0.000000e+00> : vector<16xf32>
    %8 = vector.multi_reduction <add>, %7, %cst_2 [1] : vector<16x32xf32> to vector<16xf32>
    %9 = vector.shape_cast %8 : vector<16xf32> to vector<16x1xf32>
    %cst_3 = arith.constant 3.200000e+01 : f32
    %10 = vector.broadcast %cst_3 : f32 to vector<16x1xf32>
    %11 = arith.divf %9, %10 : vector<16x1xf32>
    %12 = vector.broadcast %4 : vector<16x1xf32> to vector<16x32xf32>
    %13 = arith.subf %0, %12 : vector<16x32xf32>
    %cst_4 = arith.constant 9.99999974E-6 : f32
    %14 = vector.broadcast %cst_4 : f32 to vector<16x1xf32>
    %15 = arith.addf %11, %14 : vector<16x1xf32>
    %16 = math.rsqrt %15 : vector<16x1xf32>
    %17 = vector.broadcast %16 : vector<16x1xf32> to vector<16x32xf32>
    %18 = arith.mulf %13, %17 : vector<16x32xf32>
    %c0_5 = arith.constant 0 : index
    %c0_6 = arith.constant 0 : index
    %19 = vector.load %arg3[%c0_5, %c0_6] : memref<1x32xf32, #tpu.memory_space<vmem>>, vector<1x32xf32>
    %20 = vector.broadcast %19 : vector<1x32xf32> to vector<16x32xf32>
    %21 = arith.mulf %18, %20 : vector<16x32xf32>
    %c0_7 = arith.constant 0 : index
    %c0_8 = arith.constant 0 : index
    %22 = vector.load %arg4[%c0_7, %c0_8] : memref<1x32xf32, #tpu.memory_space<vmem>>, vector<1x32xf32>
    %23 = vector.broadcast %22 : vector<1x32xf32> to vector<16x32xf32>
    %24 = arith.addf %21, %23 : vector<16x32xf32>
    %25 = arith.truncf %24 : vector<16x32xf32> to vector<16x32xbf16>
    %c0_9 = arith.constant 0 : index
    %c0_10 = arith.constant 0 : index
    %26 = vector.load %arg5[%c0_9, %c0_10] : memref<32x32xbf16, #tpu.memory_space<vmem>>, vector<32x32xbf16>
    %cst_11 = arith.constant dense<0.000000e+00> : vector<16x32xf32>
    %27 = tpu.matmul %25, %26, %cst_11 {dimension_numbers = #tpu.dot_dimension_numbers<[1], [0], [0], [1], [0, 0, 1, 1], [], []>} : vector<16x32xbf16>, vector<32x32xbf16>, vector<16x32xf32> -> vector<16x32xf32>
    %c0_12 = arith.constant 0 : index
    %c0_13 = arith.constant 0 : index
    %28 = vector.load %arg6[%c0_12, %c0_13] : memref<1x32xf32, #tpu.memory_space<vmem>>, vector<1x32xf32>
    %29 = vector.broadcast %28 : vector<1x32xf32> to vector<16x32xf32>
    %30 = arith.addf %27, %29 : vector<16x32xf32>
    %31 = arith.addf %0, %30 : vector<16x32xf32>
    %c0_14 = arith.constant 0 : index
    %c0_15 = arith.constant 0 : index
    %32 = vector.load %arg7[%c0_14, %c0_15] : memref<16x32xf32, #tpu.memory_space<vmem>>, vector<16x32xf32>
    tpu.vector_store %arg7[%c0_14, %c0_15], %31 {strides = array<i32>} : memref<16x32xf32, #tpu.memory_space<vmem>>, vector<16x32xf32>,
    return
  }
  func.func @transform_0(%arg0: i32, %arg1: memref<1xi32, #tpu.memory_space<smem>>) -> (i32, i32) {
    %c0_i32 = arith.constant 0 : i32
    %c0_i32_0 = arith.constant 0 : i32
    return %arg0, %c0_i32 : i32, i32
  }
  func.func @transform_1(%arg0: i32, %arg1: memref<1xi32, #tpu.memory_space<smem>>) -> (i32, i32) {
    %c0_i32 = arith.constant 0 : i32
    %c0_i32_0 = arith.constant 0 : i32
    %c0_i32_1 = arith.constant 0 : i32
    return %c0_i32, %c0_i32_0 : i32, i32
  }
  func.func @transform_2(%arg0: i32, %arg1: memref<1xi32, #tpu.memory_space<smem>>) -> (i32, i32) {
    %c0_i32 = arith.constant 0 : i32
    %c0_i32_0 = arith.constant 0 : i32
    %c0_i32_1 = arith.constant 0 : i32
    return %c0_i32, %c0_i32_0 : i32, i32
  }
  func.func @transform_3(%arg0: i32, %arg1: memref<1xi32, #tpu.memory_space<smem>>) -> (i32, i32) {
    %c0_i32 = arith.constant 0 : i32
    %c0_i32_0 = arith.constant 0 : i32
    %c0_i32_1 = arith.constant 0 : i32
    return %c0_i32, %c0_i32_0 : i32, i32
  }
  func.func @transform_4(%arg0: i32, %arg1: memref<1xi32, #tpu.memory_space<smem>>) -> (i32, i32) {
    %c0_i32 = arith.constant 0 : i32
    %c0_i32_0 = arith.constant 0 : i32
    %c0_i32_1 = arith.constant 0 : i32
    return %c0_i32, %c0_i32_0 : i32, i32
  }
  func.func @transform_5(%arg0: i32, %arg1: memref<1xi32, #tpu.memory_space<smem>>) -> (i32, i32) {
    %c0_i32 = arith.constant 0 : i32
    %c0_i32_0 = arith.constant 0 : i32
    return %arg0, %c0_i32 : i32, i32
  }
}

</mosaic_0001>

<bundles_post_ra>
// kernel: tpu_custom_call.1
= control target key start
LH: loop header
LB: loop body
LE: loop exit
PB: predicated region body
PF: predicated region fallthrough
CT: control target
= control target key end

     0   :  { %12 = vsyncpa [#allocation5], 0  ;;  %s396_s0 = inlined_call_operand.<no memory space> [shape: s32[1], index: 0, kind: input, shape index: {}]   ;;  %s397_s1 = inlined_call_operand.hbm [shape: f32[16,32], index: 1, kind: input, shape index: {}]   ;;  %s398_s2 = inlined_call_operand.vmem [shape: f32[1,32], index: 2, kind: input, shape index: {}]   ;;  %s399_s3 = inlined_call_operand.vmem [shape: f32[1,32], index: 3, kind: input, shape index: {}]   ;;  %s400_s4 = inlined_call_operand.hbm [shape: bf16[32,32], index: 4, kind: input, shape index: {}]   ;;  %s401_s5 = inlined_call_operand.vmem [shape: f32[1,32], index: 5, kind: input, shape index: {}]   ;;  %s402_s6 = inlined_call_operand.hbm [shape: f32[16,32], index: 6, kind: output, shape index: {}]  }
   0x1   :  { %13 = vsyncpa [#allocation8], 0 }
   0x2   :  { %14 = vsyncpa [#allocation6], 0  ;;  %s294_s0 = smov [#allocation4]   ;;  %s222_s24 = scalar_lea.hbm %s397_s1, 256 }
   0x3   :  { %s20_s21 = sshll.u32 %s294_s0, 4  ;;  %p223_p0 = scmp.ne.s32.totalorder %s397_s1, %s222_s24  ;;  %s21_s21 = int_to_ptr.vmem [resolvable:$true] %s20_s21 }
   0x4   :  { %p226_p1 = scmp.lt.u32.totalorder %s222_s24, %s397_s1 }
   0x6   :  { %p228_p2 = pnand %p226_p1, %p223_p0 }
   0x8   :  { %231 = shalt.err (!%p228_p2)
}
   0x9   :  { %s232_s29 = scalar_lea.vmem %s21_s21, 256  ;;  %p237_p4 = scmp.lt.s32.totalorder %s21_s21, %s21_s21 }
   0xa   :  { %p233_p3 = scmp.ne.s32.totalorder %s21_s21, %s232_s29  ;;  %p238_p5 = scmp.lt.s32.totalorder %s232_s29, %s232_s29 }
   0xc   :  { %p239_p6 = por %p238_p5, %p237_p4 }
   0xe   :  { %p240_p7 = pnand %p239_p6, %p233_p3 }
  0x10   :  { %243 = shalt.err (!%p240_p7)
}
  0x11   :  { %s295_s30 = smov 128   ;;  %s296_s7 = smov 8  }
  0x12   :  { %26 = dma.hbm_to_vmem [thread:$0]  %s397_s1, 256, %s21_s21, [#allocation5], %s295_s30, %s295_s30, %s296_s7  }
  0x13   :  { %s297_s10 = smov [#allocation7]   ;;  %s244_s14 = scalar_lea.hbm %s400_s4, 256 }
  0x14   :  { %s36_s11 = sshll.u32 %s297_s10, 4  ;;  %p245_p8 = scmp.ne.s32.totalorder %s400_s4, %s244_s14  ;;  %s37_s11 = int_to_ptr.vmem [resolvable:$true] %s36_s11 }
  0x15   :  { %p248_p9 = scmp.lt.u32.totalorder %s244_s14, %s400_s4 }
  0x17   :  { %p250_p10 = pnand %p248_p9, %p245_p8 }
  0x19   :  { %253 = shalt.err (!%p250_p10)
}
  0x1a   :  { %s254_s19 = scalar_lea.vmem %s37_s11, 256  ;;  %p259_p12 = scmp.lt.s32.totalorder %s37_s11, %s37_s11 }
  0x1b   :  { %p255_p11 = scmp.ne.s32.totalorder %s37_s11, %s254_s19  ;;  %p260_p13 = scmp.lt.s32.totalorder %s254_s19, %s254_s19 }
  0x1d   :  { %p261_p0 = por %p260_p13, %p259_p12 }
  0x1f   :  { %p262_p1 = pnand %p261_p0, %p255_p11 }
  0x21   :  { %265 = shalt.err (!%p262_p1)
}
  0x22   :  { %s298_s1 = smov 64   ;;  %s299_s20 = smov 4  }
  0x23   :  { %42 = dma.hbm_to_vmem [thread:$0]  %s400_s4, 256, %s37_s11, [#allocation8], %s298_s1, %s298_s1, %s299_s20  }
  0x24   :  { %288 = dma.done.wait [#allocation5], 256  }
  0x25   :  { %289 = vsyncadd [#allocation5], 4294967040 }
  0x26   :  { %290 = dma.done.wait [#allocation8], 256  }
  0x27   :  { %291 = vsyncadd [#allocation8], 4294967040  ;;  %vm54_vm0 = vcmask 261120   ;;  %v52_v0 = vld [vmem:[#allocation4] sm:$0xff]  ;;  %v53_v1 = vld [vmem:[#allocation4 + $0x8] sm:$0xff]  ;;  %v300_v15 = vmov 0.0  }
  0x28   :  { %v55_v2 = vsel %vm54_vm0, %v52_v0, 0.0  ;;  %v58_v3 = vsel %vm54_vm0, %v53_v1, 0.0  ;;  %v216_v14 = vld [vmem:[#allocation7] sm:$0xff]   ;;  %199 = vmatprep.subr.bf16.mxu0 %v300_v15  ;;  %v217_v16 = vld [vmem:[#allocation7 + $0x8] sm:$0xff]   ;;  %vm301_vm1 = vmmov 0  }
  0x29   :  { %56 = vadd.xlane.f32.xlu0 %v55_v2  ;;  %200 = vmatpush3.bf16.msra.mxu0 %v216_v14  ;;  %v190_v25 = vld [vmem:[%s398_s2] ss:$0 sm:$0xff]  ;;  %s302_s2 = smov [#allocation9]  }
  0x2a   :  { %203 = vmatprep.mubr.msk.bf16.mxu0 %vm301_vm1, %v300_v15  ;;  %201 = vmatprep.subr.bf16.mxu0 %v300_v15  ;;  %v191_v29 = vld [vmem:[%s399_s3] ss:$0 sm:$0xff]  ;;  %s177_s27 = sshll.u32 %s302_s2, 4  ;;  %s178_s27 = int_to_ptr.vmem [resolvable:$true] %s177_s27 }
  0x2b   :  { %v192_v34 = vld [vmem:[%s401_s5] ss:$0 sm:$0xff]  ;;  %s266_s3 = scalar_lea.vmem %s178_s27, 256  ;;  %p271_p3 = scmp.lt.s32.totalorder %s178_s27, %s178_s27 }
  0x2c   :  { %p267_p2 = scmp.ne.s32.totalorder %s178_s27, %s266_s3  ;;  %p272_p4 = scmp.lt.s32.totalorder %s266_s3, %s266_s3 }
  0x2d   :  { %59 = vadd.xlane.f32.xlu0 %v58_v3  ;;  %202 = vmatpush3.bf16.msra.mxu0 %v217_v16 }
  0x2e   :  { %p273_p5 = por %p272_p4, %p271_p3 }
  0x30   :  { %p274_p6 = pnand %p273_p5, %p267_p2 }
  0xb6   :  { %v57_v4 = vpop.xlane.xlu0 %56 }
  0xb7   :  { %v62_v5 = vmul.f32 0.03125, %v57_v4 }
  0xb9   :  { %v64_v6 = vsub.f32 %v52_v0, %v62_v5 }
  0xba   :  { %v60_v7 = vpop.xlane.xlu0 %59 }
  0xbb   :  { %v63_v8 = vmul.f32 0.03125, %v60_v7  ;;  %v66_v9 = vmul.f32 %v64_v6, %v64_v6 }
  0xbd   :  { %v65_v10 = vsub.f32 %v53_v1, %v63_v8  ;;  %v68_v11 = vsel %vm54_vm0, %v66_v9, 0.0 }
  0xbe   :  { %69 = vadd.xlane.f32.xlu1 %v68_v11 }
  0xbf   :  { %v67_v12 = vmul.f32 %v65_v10, %v65_v10 }
  0xc1   :  { %v71_v13 = vsel %vm54_vm0, %v67_v12, 0.0 }
  0xc2   :  { %72 = vadd.xlane.f32.xlu1 %v71_v13 }
 0x14b   :  { %v70_v17 = vpop.xlane.xlu1 %69 }
 0x14c   :  { %v74_v18 = vmul.f32 0.03125, %v70_v17 }
 0x14e   :  { %v76_v19 = vadd.f32 1e-05, %v74_v18 }
 0x14f   :  { %v73_v20 = vpop.xlane.xlu1 %72 }
 0x150   :  { %218 = vrsqrt.f32 %v76_v19  ;;  %v75_v21 = vmul.f32 0.03125, %v73_v20 }
 0x152   :  { %v77_v22 = vadd.f32 1e-05, %v75_v21 }
 0x154   :  { %220 = vrsqrt.f32 %v77_v22 }
 0x15a   :  { %v219_v23 = vpop.eup %218 }
 0x15b   :  { %v80_v24 = vmul.f32 %v219_v23, %v64_v6 }
 0x15d   :  { %v89_v28 = vmul.f32 %v190_v25, %v80_v24 }
 0x15e   :  { %v221_v26 = vpop.eup %220 }
 0x15f   :  { %v81_v27 = vmul.f32 %v221_v26, %v65_v10  ;;  %v98_v31 = vadd.f32 %v191_v29, %v89_v28 }
 0x161   :  { %v90_v30 = vmul.f32 %v190_v25, %v81_v27 }
 0x163   :  { %v99_v32 = vadd.f32 %v191_v29, %v90_v30 }
 0x165   :  { %v100_v33 = vpack.c.bf16 %v99_v32, %v98_v31 }
 0x167   :  { %204 = vmatmul.mubr.msk.bf16.vlgmr.msra.gmra.mrb[0].mxu0 %vm54_vm0, %v100_v33 }
 0x23a   :  { %v161_v35 = vpop.f32.mrb[0].mxu0 }
 0x23b   :  { %v162_v36 = vadd.f32 %v192_v34, %v161_v35  ;;  %v205_v37 = vpop.f32.mrb[1].mxu0 }
 0x23c   :  { %v164_v38 = vpop.f32.mrb[2].mxu0 }
 0x23d   :  { %v168_v39 = vadd.f32 %v162_v36, %v52_v0  ;;  %v165_v40 = vadd.f32 %v192_v34, %v164_v38  ;;  %v206_v41 = vpop.f32.mrb[3].mxu0 }
 0x23f   :  { %170 = vst.msk [vmem:[#allocation9] sm:$0xff] %vm54_vm0, %v168_v39  ;;  %v169_v42 = vadd.f32 %v165_v40, %v53_v1 }
 0x241   :  { %171 = vst.msk [vmem:[#allocation9 + $0x8] sm:$0xff] %vm54_vm0, %v169_v42 }
 0x242   :  { %277 = shalt.err (!%p274_p6)
}
 0x243   :  { %s278_s29 = scalar_lea.hbm %s402_s6, 256 }
 0x244   :  { %p279_p7 = scmp.ne.s32.totalorder %s402_s6, %s278_s29  ;;  %p282_p8 = scmp.lt.u32.totalorder %s278_s29, %s402_s6 }
 0x246   :  { %p284_p9 = pnand %p282_p8, %p279_p7 }
 0x248   :  { %287 = shalt.err (!%p284_p9)
}
 0x249   :  { %183 = dma.vmem_to_hbm [thread:$0]  %s178_s27, 256, %s402_s6, [#allocation6], %s295_s30, %s295_s30, %s296_s7  }
 0x24a   :  { %292 = dma.done.wait [#allocation6], 256  }
 0x24b   :  { %293 = vsyncadd [#allocation6], 4294967040 }
 0x24c   :  { %187 = vsyncpa [#allocation5], 1 }
 0x24d   :  { %188 = vsyncpa [#allocation8], 1 }
 0x24e   :  { %189 = vsyncpa [#allocation6], 1 }

</bundles_post_ra>
